<compile_context>
chip_gen: v5e
topology: v5e:2x2
jax: 0.10.0
libtpu: 0.0.40
codegen_flags: <defaults>
</compile_context>

<pallas_src>
import math

import jax
import jax.numpy as jnp
from jax.experimental import pallas as pl
from jax.experimental.pallas import tpu as pltpu

CATEGORIES = {
    "gender": 3,
    "material": 23,
    "pattern": 18,
    "style": 10,
    "sleeve": 4,
    "category": 48,
    "color": 19,
}

_LN2 = math.log(2.0)


def _make_loss_kernel(B, pad_rows, C_pad, offsets, sizes, weights):
    """Kernel with all shape/offset/weight info baked in as compile-time constants."""
    n_cat = len(sizes)

    def kernel(pred_ref, targ_ref, out_ref, col_acc):
        step = pl.program_id(0)

        @pl.when(step == 0)
        def _():
            col_acc[...] = jnp.zeros_like(col_acc)

        x = pred_ref[...].astype(jnp.float32)   # logits  (TILE_B, C_pad)
        y = targ_ref[...].astype(jnp.float32)   # targets (TILE_B, C_pad), bf16 -> f32
        # Numerically stable BCEWithLogits: max(x,0) - x*y + log1p(exp(-|x|)).
        per_elem = jnp.maximum(x, 0.0) - x * y + jnp.log1p(jnp.exp(-jnp.abs(x)))
        # No per-element row mask: zero-padded rows contribute exactly ln(2) per
        # lane; the compile-time constant is subtracted in the finalize.
        col_acc[...] += jnp.sum(per_elem, axis=0, keepdims=True)

        @pl.when(step == pl.num_programs(0) - 1)
        def _():
            col_sums = col_acc[...]                                   # (1, C_pad)
            lane_ids = jax.lax.broadcasted_iota(jnp.int32, (1, C_pad), 1)
            out_lane = jax.lax.broadcasted_iota(jnp.int32, out_ref.shape, 1)
            pad_corr = jnp.float32(pad_rows * _LN2 / B)
            vals = jnp.zeros(out_ref.shape, jnp.float32)
            total = jnp.float32(0.0)
            for i in range(n_cat):
                off, c = offsets[i], sizes[i]
                head_mask = (lane_ids >= off) & (lane_ids < off + c)
                # Compile-time 1/(B*c) and padding correction: no runtime divide.
                mean_i = (jnp.sum(jnp.where(head_mask, col_sums, 0.0))
                          * (1.0 / (B * c)) - pad_corr)
                total = total + mean_i * weights[i]
                vals = jnp.where(out_lane == i, mean_i, vals)
            vals = jnp.where(out_lane == n_cat, total, vals)
            out_ref[...] = vals

    return kernel


def fashion_multihead_loss(predictions, targets, weights=None, categories=CATEGORIES,
                           max_tile_rows=1024):
    names = list(categories.keys())
    sizes = [int(categories[n]) for n in names]
    n_cat = len(names)
    if weights is None:
        weights = [1.0] * n_cat
    weights = [float(w) for w in weights]

    offsets, off = [], 0
    for c in sizes:
        offsets.append(off)
        off += c
    C_total = off                                    # 125
    C_pad = max(128, ((C_total + 127) // 128) * 128)  # 128

    B = predictions[names[0]].shape[0]
    B_pad8 = ((B + 7) // 8) * 8
    tile_b = B_pad8 if B_pad8 <= max_tile_rows else max_tile_rows
    B_total = ((B + tile_b - 1) // tile_b) * tile_b
    num_tiles = B_total // tile_b
    pad_rows = B_total - B

    # One concatenate + one zero-pad per tensor into a lane-dense slab.
    # Predictions keep their upstream dtype; targets go over HBM as bf16
    # (exact for 0/1 labels), halving that DMA stream.
    # TODO(synk): if the 7 heads come from one contiguous upstream projection,
    # pass that activation directly and skip this concat/pad round trip.
    pred_cat = jnp.concatenate([predictions[n] for n in names], axis=1)
    targ_cat = jnp.concatenate([targets[n].astype(jnp.bfloat16) for n in names], axis=1)
    pred_slab = jnp.pad(pred_cat, ((0, B_total - B), (0, C_pad - C_total)))
    targ_slab = jnp.pad(targ_cat, ((0, B_total - B), (0, C_pad - C_total)))

    kernel = _make_loss_kernel(B, pad_rows, C_pad, offsets, sizes, weights)

    pred_bytes = B_total * C_pad * jnp.dtype(pred_slab.dtype).itemsize
    targ_bytes = B_total * C_pad * jnp.dtype(targ_slab.dtype).itemsize
    cost = pl.CostEstimate(
        flops=8 * B_total * C_pad,
        transcendentals=2 * B_total * C_pad,
        bytes_accessed=pred_bytes + targ_bytes + 8 * 128 * 4,
    )

    # TODO(synk): on v7x, add a leading parallel grid axis of size 2 (per-core
    # partial col_sums outputs + one wrapper add) to use both TensorCores.
    out_tile = pl.pallas_call(
        kernel,
        out_shape=jax.ShapeDtypeStruct((8, 128), jnp.float32),
        grid_spec=pltpu.PrefetchScalarGridSpec(
            num_scalar_prefetch=0,
            grid=(num_tiles,),
            in_specs=[
                pl.BlockSpec((tile_b, C_pad), lambda i: (i, 0)),
                pl.BlockSpec((tile_b, C_pad), lambda i: (i, 0)),
            ],
            out_specs=pl.BlockSpec((8, 128), lambda i: (0, 0)),
            scratch_shapes=[pltpu.VMEM((1, C_pad), jnp.float32)],
        ),
        compiler_params=pltpu.CompilerParams(
            dimension_semantics=("arbitrary",),        # reduction axis, resident output
            vmem_limit_bytes=32 * 1024 * 1024,
        ),
        cost_estimate=cost,
    )(pred_slab, targ_slab)

    per_cat = out_tile[0, :n_cat]        # per-category BCE means
    total_loss = out_tile[0, n_cat]      # weighted total (computed in-kernel)
    loss_dict = {f"{name}_loss": per_cat[i] for i, name in enumerate(names)}
    return total_loss, loss_dict


def _reference_loss(predictions, targets, weights, categories):
    # Pure-JAX reference of nn.BCEWithLogitsLoss(reduction='mean') per head.
    names = list(categories.keys())
    total = 0.0
    per = {}
    for i, name in enumerate(names):
        x = predictions[name].astype(jnp.float32)
        y = targets[name].astype(jnp.float32)
        l = jnp.mean(jnp.maximum(x, 0.0) - x * y + jnp.log1p(jnp.exp(-jnp.abs(x))))
        per[f"{name}_loss"] = l
        total = total + l * weights[i]
    return total, per


if __name__ == "__main__":
    B = 2
    key = jax.random.PRNGKey(0)
    predictions = {}
    targets = {}
    for name, C in CATEGORIES.items():
        key, k1, k2 = jax.random.split(key, 3)
        predictions[name] = jax.random.normal(k1, (B, C), jnp.float32)
        targets[name] = jax.random.bernoulli(k2, 0.3, (B, C)).astype(jnp.int32)

    weights = [1.0] * len(CATEGORIES)

    total_loss, loss_dict = fashion_multihead_loss(predictions, targets, weights)
    total_loss = jax.block_until_ready(total_loss)
    loss_dict = jax.tree_util.tree_map(jax.block_until_ready, loss_dict)

    ref_total, ref_dict = _reference_loss(predictions, targets, weights, CATEGORIES)
    assert jnp.allclose(total_loss, ref_total, rtol=1e-5, atol=1e-5)
    for k in loss_dict:
        assert jnp.allclose(loss_dict[k], ref_dict[k], rtol=1e-5, atol=1e-5)

    print("KERNEL_OK")
</pallas_src>

<mosaic_0001>
module attributes {stable_mosaic.version = 11 : i64} {
  func.func @kernel(%arg0: i32, %arg1: memref<8x128xf32, #tpu.memory_space<vmem>>, %arg2: memref<8x128xbf16, #tpu.memory_space<vmem>>, %arg3: memref<8x128xf32, #tpu.memory_space<vmem>>, %arg4: memref<1x128xf32, #tpu.memory_space<vmem>>) attributes {dimension_semantics = [#tpu.dimension_semantics<arbitrary>], iteration_bounds = array<i64: 1>, scalar_prefetch = 0 : i64, scratch_operands = 1 : i64, tpu.core_type = #tpu.core_type<tc>, window_params = [{transform_indices = @transform_0, window_bounds = array<i64: 8, 128>}, {transform_indices = @transform_1, window_bounds = array<i64: 8, 128>}, {pipeline_mode = #tpu.pipeline_mode<synchronous>, transform_indices = @transform_2, window_bounds = array<i64: 8, 128>}]} {
    %c0_i32 = arith.constant 0 : i32
    %0 = arith.cmpi eq, %arg0, %c0_i32 : i32
    %1 = arith.extui %0 : i1 to i32
    %c0_i32_0 = arith.constant 0 : i32
    %2 = arith.cmpi ne, %1, %c0_i32_0 : i32
    scf.if %2 {
      %cst_12 = arith.constant 0.000000e+00 : f32
      %24 = vector.broadcast %cst_12 : f32 to vector<1x128xf32>
      %c0_13 = arith.constant 0 : index
      %c0_14 = arith.constant 0 : index
      %25 = vector.load %arg4[%c0_13, %c0_14] : memref<1x128xf32, #tpu.memory_space<vmem>>, vector<1x128xf32>
      tpu.vector_store %arg4[%c0_13, %c0_14], %24 {strides = array<i32>} : memref<1x128xf32, #tpu.memory_space<vmem>>, vector<1x128xf32>,
    } else {
    }
    %c0 = arith.constant 0 : index
    %c0_1 = arith.constant 0 : index
    %3 = vector.load %arg1[%c0, %c0_1] : memref<8x128xf32, #tpu.memory_space<vmem>>, vector<8x128xf32>
    %c0_2 = arith.constant 0 : index
    %c0_3 = arith.constant 0 : index
    %4 = vector.load %arg2[%c0_2, %c0_3] : memref<8x128xbf16, #tpu.memory_space<vmem>>, vector<8x128xbf16>
    %5 = arith.extf %4 : vector<8x128xbf16> to vector<8x128xf32>
    %cst = arith.constant 0.000000e+00 : f32
    %6 = vector.broadcast %cst : f32 to vector<8x128xf32>
    %7 = arith.maximumf %3, %6 : vector<8x128xf32>
    %8 = arith.mulf %3, %5 : vector<8x128xf32>
    %9 = arith.subf %7, %8 : vector<8x128xf32>
    %10 = math.absf %3 : vector<8x128xf32>
    %cst_4 = arith.constant 0.000000e+00 : f32
    %11 = vector.broadcast %cst_4 : f32 to vector<8x128xf32>
    %12 = arith.subf %11, %10 : vector<8x128xf32>
    %13 = math.exp %12 : vector<8x128xf32>
    %14 = math.log1p %13 : vector<8x128xf32>
    %15 = arith.addf %9, %14 : vector<8x128xf32>
    %c0_5 = arith.constant 0 : index
    %c0_6 = arith.constant 0 : index
    %16 = vector.load %arg4[%c0_5, %c0_6] : memref<1x128xf32, #tpu.memory_space<vmem>>, vector<1x128xf32>
    %cst_7 = arith.constant dense<0.000000e+00> : vector<128xf32>
    %17 = vector.multi_reduction <add>, %15, %cst_7 [0] : vector<8x128xf32> to vector<128xf32>
    %18 = vector.shape_cast %17 : vector<128xf32> to vector<1x128xf32>
    %19 = arith.addf %16, %18 : vector<1x128xf32>
    %c0_8 = arith.constant 0 : index
    %c0_9 = arith.constant 0 : index
    %20 = vector.load %arg4[%c0_8, %c0_9] : memref<1x128xf32, #tpu.memory_space<vmem>>, vector<1x128xf32>
    tpu.vector_store %arg4[%c0_8, %c0_9], %19 {strides = array<i32>} : memref<1x128xf32, #tpu.memory_space<vmem>>, vector<1x128xf32>,
    %c0_i32_10 = arith.constant 0 : i32
    %21 = arith.cmpi eq, %arg0, %c0_i32_10 : i32
    %22 = arith.extui %21 : i1 to i32
    %c0_i32_11 = arith.constant 0 : i32
    %23 = arith.cmpi ne, %22, %c0_i32_11 : i32
    scf.if %23 {
      %c0_12 = arith.constant 0 : index
      %c0_13 = arith.constant 0 : index
      %24 = vector.load %arg4[%c0_12, %c0_13] : memref<1x128xf32, #tpu.memory_space<vmem>>, vector<1x128xf32>
      %25 = tpu.iota {dimensions = array<i32: 1>} : vector<1x128xi32>
      %26 = tpu.iota {dimensions = array<i32: 1>} : vector<8x128xi32>
      %cst_14 = arith.constant 0.000000e+00 : f32
      %27 = vector.broadcast %cst_14 : f32 to vector<8x128xf32>
      %c0_i32_15 = arith.constant 0 : i32
      %28 = vector.broadcast %c0_i32_15 : i32 to vector<1x128xi32>
      %29 = arith.cmpi sge, %25, %28 : vector<1x128xi32>
      %c3_i32 = arith.constant 3 : i32
      %30 = vector.broadcast %c3_i32 : i32 to vector<1x128xi32>
      %31 = arith.cmpi slt, %25, %30 : vector<1x128xi32>
      %32 = arith.andi %29, %31 : vector<1x128xi1>
      %cst_16 = arith.constant 0.000000e+00 : f32
      %33 = vector.broadcast %cst_16 : f32 to vector<1x128xf32>
      %34 = arith.select %32, %24, %33 : vector<1x128xi1>, vector<1x128xf32>
      %35 = vector.shape_cast %34 : vector<1x128xf32> to vector<1x1x128xf32>
      %cst_17 = arith.constant dense<0.000000e+00> : vector<1xf32>
      %36 = vector.multi_reduction <add>, %35, %cst_17 [1, 2] : vector<1x1x128xf32> to vector<1xf32>
      %37 = vector.shape_cast %36 : vector<1xf32> to vector<1x1x1xf32>
      %38 = vector.extract %37[0, 0, 0] : f32 from vector<1x1x1xf32>
      %cst_18 = arith.constant 0.166666672 : f32
      %39 = arith.mulf %38, %cst_18 : f32
      %cst_19 = arith.constant 2.07944155 : f32
      %40 = arith.subf %39, %cst_19 : f32
      %cst_20 = arith.constant 1.000000e+00 : f32
      %41 = arith.mulf %40, %cst_20 : f32
      %cst_21 = arith.constant 0.000000e+00 : f32
      %42 = arith.addf %cst_21, %41 : f32
      %c0_i32_22 = arith.constant 0 : i32
      %43 = vector.broadcast %c0_i32_22 : i32 to vector<8x128xi32>
      %44 = arith.cmpi eq, %26, %43 : vector<8x128xi32>
      %45 = vector.broadcast %40 : f32 to vector<8x128xf32>
      %46 = arith.select %44, %45, %27 : vector<8x128xi1>, vector<8x128xf32>
      %c3_i32_23 = arith.constant 3 : i32
      %47 = vector.broadcast %c3_i32_23 : i32 to vector<1x128xi32>
      %48 = arith.cmpi sge, %25, %47 : vector<1x128xi32>
      %c26_i32 = arith.constant 26 : i32
      %49 = vector.broadcast %c26_i32 : i32 to vector<1x128xi32>
      %50 = arith.cmpi slt, %25, %49 : vector<1x128xi32>
      %51 = arith.andi %48, %50 : vector<1x128xi1>
      %cst_24 = arith.constant 0.000000e+00 : f32
      %52 = vector.broadcast %cst_24 : f32 to vector<1x128xf32>
      %53 = arith.select %51, %24, %52 : vector<1x128xi1>, vector<1x128xf32>
      %54 = vector.shape_cast %53 : vector<1x128xf32> to vector<1x1x128xf32>
      %cst_25 = arith.constant dense<0.000000e+00> : vector<1xf32>
      %55 = vector.multi_reduction <add>, %54, %cst_25 [1, 2] : vector<1x1x128xf32> to vector<1xf32>
      %56 = vector.shape_cast %55 : vector<1xf32> to vector<1x1x1xf32>
      %57 = vector.extract %56[0, 0, 0] : f32 from vector<1x1x1xf32>
      %cst_26 = arith.constant 0.0217391308 : f32
      %58 = arith.mulf %57, %cst_26 : f32
      %cst_27 = arith.constant 2.07944155 : f32
      %59 = arith.subf %58, %cst_27 : f32
      %cst_28 = arith.constant 1.000000e+00 : f32
      %60 = arith.mulf %59, %cst_28 : f32
      %61 = arith.addf %42, %60 : f32
      %c1_i32 = arith.constant 1 : i32
      %62 = vector.broadcast %c1_i32 : i32 to vector<8x128xi32>
      %63 = arith.cmpi eq, %26, %62 : vector<8x128xi32>
      %64 = vector.broadcast %59 : f32 to vector<8x128xf32>
      %65 = arith.select %63, %64, %46 : vector<8x128xi1>, vector<8x128xf32>
      %c26_i32_29 = arith.constant 26 : i32
      %66 = vector.broadcast %c26_i32_29 : i32 to vector<1x128xi32>
      %67 = arith.cmpi sge, %25, %66 : vector<1x128xi32>
      %c44_i32 = arith.constant 44 : i32
      %68 = vector.broadcast %c44_i32 : i32 to vector<1x128xi32>
      %69 = arith.cmpi slt, %25, %68 : vector<1x128xi32>
      %70 = arith.andi %67, %69 : vector<1x128xi1>
      %cst_30 = arith.constant 0.000000e+00 : f32
      %71 = vector.broadcast %cst_30 : f32 to vector<1x128xf32>
      %72 = arith.select %70, %24, %71 : vector<1x128xi1>, vector<1x128xf32>
      %73 = vector.shape_cast %72 : vector<1x128xf32> to vector<1x1x128xf32>
      %cst_31 = arith.constant dense<0.000000e+00> : vector<1xf32>
      %74 = vector.multi_reduction <add>, %73, %cst_31 [1, 2] : vector<1x1x128xf32> to vector<1xf32>
      %75 = vector.shape_cast %74 : vector<1xf32> to vector<1x1x1xf32>
      %76 = vector.extract %75[0, 0, 0] : f32 from vector<1x1x1xf32>
      %cst_32 = arith.constant 0.027777778 : f32
      %77 = arith.mulf %76, %cst_32 : f32
      %cst_33 = arith.constant 2.07944155 : f32
      %78 = arith.subf %77, %cst_33 : f32
      %cst_34 = arith.constant 1.000000e+00 : f32
      %79 = arith.mulf %78, %cst_34 : f32
      %80 = arith.addf %61, %79 : f32
      %c2_i32 = arith.constant 2 : i32
      %81 = vector.broadcast %c2_i32 : i32 to vector<8x128xi32>
      %82 = arith.cmpi eq, %26, %81 : vector<8x128xi32>
      %83 = vector.broadcast %78 : f32 to vector<8x128xf32>
      %84 = arith.select %82, %83, %65 : vector<8x128xi1>, vector<8x128xf32>
      %c44_i32_35 = arith.constant 44 : i32
      %85 = vector.broadcast %c44_i32_35 : i32 to vector<1x128xi32>
      %86 = arith.cmpi sge, %25, %85 : vector<1x128xi32>
      %c54_i32 = arith.constant 54 : i32
      %87 = vector.broadcast %c54_i32 : i32 to vector<1x128xi32>
      %88 = arith.cmpi slt, %25, %87 : vector<1x128xi32>
      %89 = arith.andi %86, %88 : vector<1x128xi1>
      %cst_36 = arith.constant 0.000000e+00 : f32
      %90 = vector.broadcast %cst_36 : f32 to vector<1x128xf32>
      %91 = arith.select %89, %24, %90 : vector<1x128xi1>, vector<1x128xf32>
      %92 = vector.shape_cast %91 : vector<1x128xf32> to vector<1x1x128xf32>
      %cst_37 = arith.constant dense<0.000000e+00> : vector<1xf32>
      %93 = vector.multi_reduction <add>, %92, %cst_37 [1, 2] : vector<1x1x128xf32> to vector<1xf32>
      %94 = vector.shape_cast %93 : vector<1xf32> to vector<1x1x1xf32>
      %95 = vector.extract %94[0, 0, 0] : f32 from vector<1x1x1xf32>
      %cst_38 = arith.constant 5.000000e-02 : f32
      %96 = arith.mulf %95, %cst_38 : f32
      %cst_39 = arith.constant 2.07944155 : f32
      %97 = arith.subf %96, %cst_39 : f32
      %cst_40 = arith.constant 1.000000e+00 : f32
      %98 = arith.mulf %97, %cst_40 : f32
      %99 = arith.addf %80, %98 : f32
      %c3_i32_41 = arith.constant 3 : i32
      %100 = vector.broadcast %c3_i32_41 : i32 to vector<8x128xi32>
      %101 = arith.cmpi eq, %26, %100 : vector<8x128xi32>
      %102 = vector.broadcast %97 : f32 to vector<8x128xf32>
      %103 = arith.select %101, %102, %84 : vector<8x128xi1>, vector<8x128xf32>
      %c54_i32_42 = arith.constant 54 : i32
      %104 = vector.broadcast %c54_i32_42 : i32 to vector<1x128xi32>
      %105 = arith.cmpi sge, %25, %104 : vector<1x128xi32>
      %c58_i32 = arith.constant 58 : i32
      %106 = vector.broadcast %c58_i32 : i32 to vector<1x128xi32>
      %107 = arith.cmpi slt, %25, %106 : vector<1x128xi32>
      %108 = arith.andi %105, %107 : vector<1x128xi1>
      %cst_43 = arith.constant 0.000000e+00 : f32
      %109 = vector.broadcast %cst_43 : f32 to vector<1x128xf32>
      %110 = arith.select %108, %24, %109 : vector<1x128xi1>, vector<1x128xf32>
      %111 = vector.shape_cast %110 : vector<1x128xf32> to vector<1x1x128xf32>
      %cst_44 = arith.constant dense<0.000000e+00> : vector<1xf32>
      %112 = vector.multi_reduction <add>, %111, %cst_44 [1, 2] : vector<1x1x128xf32> to vector<1xf32>
      %113 = vector.shape_cast %112 : vector<1xf32> to vector<1x1x1xf32>
      %114 = vector.extract %113[0, 0, 0] : f32 from vector<1x1x1xf32>
      %cst_45 = arith.constant 1.250000e-01 : f32
      %115 = arith.mulf %114, %cst_45 : f32
      %cst_46 = arith.constant 2.07944155 : f32
      %116 = arith.subf %115, %cst_46 : f32
      %cst_47 = arith.constant 1.000000e+00 : f32
      %117 = arith.mulf %116, %cst_47 : f32
      %118 = arith.addf %99, %117 : f32
      %c4_i32 = arith.constant 4 : i32
      %119 = vector.broadcast %c4_i32 : i32 to vector<8x128xi32>
      %120 = arith.cmpi eq, %26, %119 : vector<8x128xi32>
      %121 = vector.broadcast %116 : f32 to vector<8x128xf32>
      %122 = arith.select %120, %121, %103 : vector<8x128xi1>, vector<8x128xf32>
      %c58_i32_48 = arith.constant 58 : i32
      %123 = vector.broadcast %c58_i32_48 : i32 to vector<1x128xi32>
      %124 = arith.cmpi sge, %25, %123 : vector<1x128xi32>
      %c106_i32 = arith.constant 106 : i32
      %125 = vector.broadcast %c106_i32 : i32 to vector<1x128xi32>
      %126 = arith.cmpi slt, %25, %125 : vector<1x128xi32>
      %127 = arith.andi %124, %126 : vector<1x128xi1>
      %cst_49 = arith.constant 0.000000e+00 : f32
      %128 = vector.broadcast %cst_49 : f32 to vector<1x128xf32>
      %129 = arith.select %127, %24, %128 : vector<1x128xi1>, vector<1x128xf32>
      %130 = vector.shape_cast %129 : vector<1x128xf32> to vector<1x1x128xf32>
      %cst_50 = arith.constant dense<0.000000e+00> : vector<1xf32>
      %131 = vector.multi_reduction <add>, %130, %cst_50 [1, 2] : vector<1x1x128xf32> to vector<1xf32>
      %132 = vector.shape_cast %131 : vector<1xf32> to vector<1x1x1xf32>
      %133 = vector.extract %132[0, 0, 0] : f32 from vector<1x1x1xf32>
      %cst_51 = arith.constant 0.010416667 : f32
      %134 = arith.mulf %133, %cst_51 : f32
      %cst_52 = arith.constant 2.07944155 : f32
      %135 = arith.subf %134, %cst_52 : f32
      %cst_53 = arith.constant 1.000000e+00 : f32
      %136 = arith.mulf %135, %cst_53 : f32
      %137 = arith.addf %118, %136 : f32
      %c5_i32 = arith.constant 5 : i32
      %138 = vector.broadcast %c5_i32 : i32 to vector<8x128xi32>
      %139 = arith.cmpi eq, %26, %138 : vector<8x128xi32>
      %140 = vector.broadcast %135 : f32 to vector<8x128xf32>
      %141 = arith.select %139, %140, %122 : vector<8x128xi1>, vector<8x128xf32>
      %c106_i32_54 = arith.constant 106 : i32
      %142 = vector.broadcast %c106_i32_54 : i32 to vector<1x128xi32>
      %143 = arith.cmpi sge, %25, %142 : vector<1x128xi32>
      %c125_i32 = arith.constant 125 : i32
      %144 = vector.broadcast %c125_i32 : i32 to vector<1x128xi32>
      %145 = arith.cmpi slt, %25, %144 : vector<1x128xi32>
      %146 = arith.andi %143, %145 : vector<1x128xi1>
      %cst_55 = arith.constant 0.000000e+00 : f32
      %147 = vector.broadcast %cst_55 : f32 to vector<1x128xf32>
      %148 = arith.select %146, %24, %147 : vector<1x128xi1>, vector<1x128xf32>
      %149 = vector.shape_cast %148 : vector<1x128xf32> to vector<1x1x128xf32>
      %cst_56 = arith.constant dense<0.000000e+00> : vector<1xf32>
      %150 = vector.multi_reduction <add>, %149, %cst_56 [1, 2] : vector<1x1x128xf32> to vector<1xf32>
      %151 = vector.shape_cast %150 : vector<1xf32> to vector<1x1x1xf32>
      %152 = vector.extract %151[0, 0, 0] : f32 from vector<1x1x1xf32>
      %cst_57 = arith.constant 0.0263157897 : f32
      %153 = arith.mulf %152, %cst_57 : f32
      %cst_58 = arith.constant 2.07944155 : f32
      %154 = arith.subf %153, %cst_58 : f32
      %cst_59 = arith.constant 1.000000e+00 : f32
      %155 = arith.mulf %154, %cst_59 : f32
      %156 = arith.addf %137, %155 : f32
      %c6_i32 = arith.constant 6 : i32
      %157 = vector.broadcast %c6_i32 : i32 to vector<8x128xi32>
      %158 = arith.cmpi eq, %26, %157 : vector<8x128xi32>
      %159 = vector.broadcast %154 : f32 to vector<8x128xf32>
      %160 = arith.select %158, %159, %141 : vector<8x128xi1>, vector<8x128xf32>
      %c7_i32 = arith.constant 7 : i32
      %161 = vector.broadcast %c7_i32 : i32 to vector<8x128xi32>
      %162 = arith.cmpi eq, %26, %161 : vector<8x128xi32>
      %163 = vector.broadcast %156 : f32 to vector<8x128xf32>
      %164 = arith.select %162, %163, %160 : vector<8x128xi1>, vector<8x128xf32>
      %c0_60 = arith.constant 0 : index
      %c0_61 = arith.constant 0 : index
      %165 = vector.load %arg3[%c0_60, %c0_61] : memref<8x128xf32, #tpu.memory_space<vmem>>, vector<8x128xf32>
      tpu.vector_store %arg3[%c0_60, %c0_61], %164 {strides = array<i32>} : memref<8x128xf32, #tpu.memory_space<vmem>>, vector<8x128xf32>,
    } else {
    }
    return
  }
  func.func @transform_0(%arg0: i32) -> (i32, i32) {
    %c0_i32 = arith.constant 0 : i32
    %c0_i32_0 = arith.constant 0 : i32
    return %arg0, %c0_i32 : i32, i32
  }
  func.func @transform_1(%arg0: i32) -> (i32, i32) {
    %c0_i32 = arith.constant 0 : i32
    %c0_i32_0 = arith.constant 0 : i32
    return %arg0, %c0_i32 : i32, i32
  }
  func.func @transform_2(%arg0: i32) -> (i32, i32) {
    %c0_i32 = arith.constant 0 : i32
    %c0_i32_0 = arith.constant 0 : i32
    %c0_i32_1 = arith.constant 0 : i32
    return %c0_i32, %c0_i32_0 : i32, i32
  }
}

</mosaic_0001>

<bundles_post_ra>
// kernel: tpu_custom_call.1
= control target key start
LH: loop header
LB: loop body
LE: loop exit
PB: predicated region body
PF: predicated region fallthrough
CT: control target
= control target key end

     0   :  { %7 = vsyncpa [#allocation4], 0  ;;  %s420_s0 = inlined_call_operand.hbm [shape: f32[8,128], index: 0, kind: input, shape index: {}]   ;;  %s421_s1 = inlined_call_operand.hbm [shape: bf16[8,128], index: 1, kind: input, shape index: {}]   ;;  %s422_s2 = inlined_call_operand.hbm [shape: f32[8,128], index: 2, kind: output, shape index: {}]  }
   0x1   :  { %8 = vsyncpa [#allocation7], 0 }
   0x2   :  { %9 = vsyncpa [#allocation5], 0  ;;  %s15_s11 = sshll.u32 %s420_s0, 4  ;;  %s350_s12 = smov [#allocation3]   ;;  %s16_s11 = int_to_ptr.hbm [resolvable:$true] %s15_s11 }
   0x3   :  { %s17_s13 = sshll.u32 %s350_s12, 4  ;;  %s26_s16 = sshll.u32 %s421_s1, 4  ;;  %s18_s13 = int_to_ptr.vmem [resolvable:$true] %s17_s13  ;;  %s27_s16 = int_to_ptr.hbm [resolvable:$true] %s26_s16 }
   0x4   :  { %20 = dma.hbm_to_vmem [thread:$0]  %s16_s11, 128, %s18_s13, [#allocation4]  }
   0x5   :  { %s351_s17 = smov [#allocation6]  }
   0x6   :  { %s28_s18 = sshll.u32 %s351_s17, 4  ;;  %s29_s18 = int_to_ptr.vmem [resolvable:$true] %s28_s18 }
   0x7   :  { %31 = dma.hbm_to_vmem [thread:$0]  %s27_s16, 64, %s29_s18, [#allocation7]  }
   0x8   :  { %344 = dma.done.wait [#allocation4], 128  }
   0x9   :  { %345 = vsyncadd [#allocation4], 4294967168 }
   0xa   :  { %346 = dma.done.wait [#allocation7], 64  }
   0xb   :  { %347 = vsyncadd [#allocation7], 4294967232  ;;  %v352_v0 = vmov 0.0   ;;  %v45_v1 = vld [vmem:[#allocation3] sm:$0xff]  ;;  %v46_v5 = vld [vmem:[#allocation6] sm:$0xf]  ;;  %v78_v24 = vlaneseq }
   0xc   :  { %44 = vst [vmem:[#allocation2] sm:$0x1] %v352_v0  ;;  %v51_v2 = vand.u32 2147483647, %v45_v1  ;;  %v47_v7 = vunpack.c.l.bf16 %v46_v5  ;;  %v48_v11 = vmax.f32 %v45_v1, 0.0  ;;  %vm84_vm10 = vcmask 1040384  }
   0xd   :  { %v375_v28 = vand.u32 127, %v78_v24  ;;  %s353_s15 = smov [#allocation8]  }
   0xe   :  { %v52_v3 = vsub.f32 0.0, %v51_v2  ;;  %v49_v12 = vmul.f32 %v47_v7, %v45_v1  ;;  %s230_s16 = sshll.u32 %s353_s15, 4  ;;  %s231_s16 = int_to_ptr.vmem [resolvable:$true] %s230_s16 }
   0xf   :  { %vm121_vm1 = vcmp.ge.s32.totalorder %v375_v28, 26  ;;  %vm122_vm2 = vcmp.lt.s32.totalorder %v375_v28, 44  ;;  %vm161_vm3 = vcmp.ge.s32.totalorder %v375_v28, 54  ;;  %vm162_vm4 = vcmp.lt.s32.totalorder %v375_v28, 58 }
  0x10   :  { %v53_v4 = vmul.f32 1.442695, %v52_v3  ;;  %v50_v16 = vsub.f32 %v48_v11, %v49_v12  ;;  %vm381_vm5 = vmand %vm121_vm1, %vm122_vm2  ;;  %vm81_vm6 = vcmp.lt.s32.totalorder %v375_v28, 3  ;;  %vm141_vm8 = vcmp.ge.s32.totalorder %v375_v28, 44 }
  0x11   :  { %vm386_vm7 = vmand %vm161_vm3, %vm162_vm4  ;;  %vm142_vm9 = vcmp.lt.s32.totalorder %v375_v28, 54  ;;  %vm101_vm11 = vcmp.ge.s32.totalorder %v375_v28, 3  ;;  %vm102_vm12 = vcmp.lt.s32.totalorder %v375_v28, 26  ;;  %vm181_vm13 = vcmp.ge.s32.totalorder %v375_v28, 58 }
  0x12   :  { %268 = vpow2.f32 %v53_v4  ;;  %vm182_vm14 = vcmp.lt.s32.totalorder %v375_v28, 106  ;;  %vm143_vm15 = vmand %vm141_vm8, %vm142_vm9  ;;  %vm201_vm2 = vcmp.ge.s32.totalorder %v375_v28, 106  ;;  %vm202_vm3 = vcmp.lt.s32.totalorder %v375_v28, 125 }
  0x13   :  { %v65_v26 = vld [vmem:[#allocation2] sm:$0x1]  ;;  %vm183_vm1 = vmand %vm181_vm13, %vm182_vm14  ;;  %vm158_vm8 = vcmp.eq.s32.totalorder %v375_v28, 3  ;;  %vm178_vm9 = vcmp.eq.s32.totalorder %v375_v28, 4 }
  0x14   :  { %vm203_vm4 = vmand %vm201_vm2, %vm202_vm3 }
  0x18   :  { %v269_v6 = vpop.eup %268 }
  0x19   :  { %v55_v8 = vadd.f32 1.0, %v269_v6  ;;  %v58_v9 = vmul.f32 -0.5, %v269_v6  ;;  %v61_v13 = vand.u32 2147483647, %v269_v6 }
  0x1b   :  { %270 = vlog2.f32 %v55_v8  ;;  %v59_v10 = vadd.f32 1.0, %v58_v9  ;;  %vm62_vm0 = vcmp.lt.f32.partialorder %v61_v13, 0.0004427343 }
  0x1d   :  { %v60_v14 = vmul.f32 %v269_v6, %v59_v10 }
  0x21   :  { %v271_v15 = vpop.eup %270 }
  0x22   :  { %v57_v17 = vmul.f32 0.6931472, %v271_v15 }
  0x24   :  { %v63_v18 = vsel %vm62_vm0, %v60_v14, %v57_v17  ;;  %vm103_vm0 = vmand %vm101_vm11, %vm102_vm12  ;;  %vm218_vm11 = vcmp.eq.s32.totalorder %v375_v28, 6  ;;  %vm221_vm12 = vcmp.eq.s32.totalorder %v375_v28, 7 }
  0x25   :  { %v64_v19 = vadd.f32 %v63_v18, %v50_v16 }
  0x27   :  { %v66_v20 = vrot.slane %v64_v19, 4 }
  0x29   :  { %v67_v21 = vadd.f32 %v66_v20, %v64_v19 }
  0x2b   :  { %v68_v22 = vrot.slane %v67_v21, 2 }
  0x2d   :  { %v69_v23 = vadd.f32 %v68_v22, %v67_v21 }
  0x2f   :  { %v70_v25 = vrot.slane %v69_v23, 1 }
  0x31   :  { %v71_v27 = vadd.f32 %v70_v25, %v69_v23 }
  0x33   :  { %v72_v29 = vadd.f32 %v71_v27, %v65_v26 }
  0x35   :  { %73 = vst [vmem:[#allocation2] sm:$0x1] %v72_v29 }
  0x3c   :  { %v77_v32 = vld [vmem:[#allocation2] sm:$0x1] }
  0x3d   :  { %v124_v33 = vsel %vm381_vm5, %v77_v32, 0.0  ;;  %v83_v34 = vsel %vm81_vm6, %v77_v32, 0.0  ;;  %v164_v35 = vsel %vm386_vm7, %v77_v32, 0.0  ;;  %v144_v39 = vsel %vm143_vm15, %v77_v32, 0.0 }
  0x3e   :  { %v125_v36 = vsel %vm84_vm10, %v124_v33, 0.0  ;;  %v85_v37 = vsel %vm84_vm10, %v83_v34, 0.0  ;;  %v165_v38 = vsel %vm84_vm10, %v164_v35, 0.0  ;;  %v104_v40 = vsel %vm103_vm0, %v77_v32, 0.0 }
  0x3f   :  { %126 = vadd.xlane.f32.xlu1 %v125_v36  ;;  %86 = vadd.xlane.f32.xlu0 %v85_v37  ;;  %v184_v41 = vsel %vm183_vm1, %v77_v32, 0.0  ;;  %v145_v42 = vsel %vm84_vm10, %v144_v39, 0.0  ;;  %v105_v43 = vsel %vm84_vm10, %v104_v40, 0.0  ;;  %v204_v45 = vsel %vm203_vm4, %v77_v32, 0.0 }
  0x40   :  { %166 = vadd.xlane.f32.xlu2 %v165_v38  ;;  %v185_v44 = vsel %vm84_vm10, %v184_v41, 0.0  ;;  %v205_v46 = vsel %vm84_vm10, %v204_v45, 0.0  ;;  %vm98_vm5 = vcmp.eq.s32.totalorder %v375_v28, 0  ;;  %vm118_vm6 = vcmp.eq.s32.totalorder %v375_v28, 1 }
  0x41   :  { %vm138_vm7 = vcmp.eq.s32.totalorder %v375_v28, 2  ;;  %vm198_vm10 = vcmp.eq.s32.totalorder %v375_v28, 5 }
  0x47   :  { %146 = vadd.xlane.f32.xlu1 %v145_v42  ;;  %106 = vadd.xlane.f32.xlu0 %v105_v43 }
  0x48   :  { %186 = vadd.xlane.f32.xlu2 %v185_v44 }
  0x4f   :  { %206 = vadd.xlane.f32.xlu0 %v205_v46 }
  0xb2   :  { %v127_v47 = vpop.xlane.xlu1 %126  ;;  %v87_v48 = vpop.xlane.xlu0 %86 }
  0xb3   :  { %v128_v49 = vrot.slane %v127_v47, 4  ;;  %v88_v50 = vrot.slane %v87_v48, 4  ;;  %v167_v51 = vpop.xlane.xlu2 %166 }
  0xb4   :  { %v168_v52 = vrot.slane %v167_v51, 4 }
  0xb5   :  { %v89_v53 = vadd.f32 %v88_v50, %v87_v48  ;;  %v129_v54 = vadd.f32 %v128_v49, %v127_v47 }
  0xb6   :  { %v169_v56 = vadd.f32 %v168_v52, %v167_v51 }
  0xb7   :  { %v90_v55 = vrot.slane %v89_v53, 2  ;;  %v130_v58 = vrot.slane %v129_v54, 2 }
  0xb8   :  { %v170_v1 = vrot.slane %v169_v56, 2 }
  0xb9   :  { %v91_v57 = vadd.f32 %v90_v55, %v89_v53  ;;  %v131_v7 = vadd.f32 %v130_v58, %v129_v54 }
  0xba   :  { %v147_v59 = vpop.xlane.xlu1 %146  ;;  %v107_v60 = vpop.xlane.xlu0 %106  ;;  %v171_v11 = vadd.f32 %v170_v1, %v169_v56 }
  0xbb   :  { %v148_v61 = vrot.slane %v147_v59, 4  ;;  %v108_v62 = vrot.slane %v107_v60, 4  ;;  %v187_v63 = vpop.xlane.xlu2 %186  ;;  %v92_v0 = vrot.slane %v91_v57, 1  ;;  %v132_v16 = vrot.slane %v131_v7, 1 }
  0xbc   :  { %v188_v2 = vrot.slane %v187_v63, 4  ;;  %v172_v20 = vrot.slane %v171_v11, 1 }
  0xbd   :  { %v149_v3 = vadd.f32 %v148_v61, %v147_v59  ;;  %v109_v4 = vadd.f32 %v108_v62, %v107_v60  ;;  %v93_v5 = vadd.f32 %v92_v0, %v91_v57  ;;  %v133_v25 = vadd.f32 %v132_v16, %v131_v7 }
  0xbe   :  { %v189_v6 = vadd.f32 %v188_v2, %v187_v63  ;;  %v173_v29 = vadd.f32 %v172_v20, %v171_v11 }
  0xbf   :  { %v150_v8 = vrot.slane %v149_v3, 2  ;;  %v110_v9 = vrot.slane %v109_v4, 2  ;;  %250 = vpush %v93_v5 }
  0xc0   :  { %v190_v10 = vrot.slane %v189_v6, 2 }
  0xc1   :  { %v151_v12 = vadd.f32 %v150_v8, %v149_v3  ;;  %v111_v13 = vadd.f32 %v110_v9, %v109_v4 }
  0xc2   :  { %v191_v14 = vadd.f32 %v190_v10, %v189_v6  ;;  %v207_v15 = vpop.xlane.xlu0 %206 }
  0xc3   :  { %v208_v17 = vrot.slane %v207_v15, 4  ;;  %v112_v18 = vrot.slane %v111_v13, 1  ;;  %v152_v19 = vrot.slane %v151_v12, 1 }
  0xc4   :  { %v192_v21 = vrot.slane %v191_v14, 1 }
  0xc5   :  { %v209_v22 = vadd.f32 %v208_v17, %v207_v15  ;;  %v113_v23 = vadd.f32 %v112_v18, %v111_v13  ;;  %v153_v24 = vadd.f32 %v152_v19, %v151_v12 }
  0xc6   :  { %v193_v27 = vadd.f32 %v192_v21, %v191_v14 }
  0xc7   :  { %v210_v26 = vrot.slane %v209_v22, 2  ;;  %252 = vpush %v113_v23 }
  0xc8   :  { %254 = vpush %v133_v25 }
  0xc9   :  { %v211_v30 = vadd.f32 %v210_v26, %v209_v22  ;;  %256 = vpush %v153_v24 }
  0xca   :  { %258 = vpush %v173_v29 }
  0xcb   :  { %260 = vpush %v193_v27  ;;  %v212_v31 = vrot.slane %v211_v30, 1 }
  0xcd   :  { %v213_v32 = vadd.f32 %v212_v31, %v211_v30 }
  0xcf   :  { %262 = vpush %v213_v32 }
  0xf0   :  { %s251_s0 = spop %250 }
  0xf1   :  { %s95_s1 = smul.f32 0.16666667, %s251_s0  ;;  %s232_s0 = sshll.u32 %s422_s2, 4  ;;  %s233_s0 = int_to_ptr.hbm [resolvable:$true] %s232_s0 }
  0xf3   :  { %s243_s19 = sadd.f32 -2.0794415, %s95_s1 }
  0xf5   :  { %v99_v33 = vstv %s243_s19 }
  0xf6   :  { %v100_v34 = vsel %vm98_vm5, %v99_v33, 0.0 }
  0xf8   :  { %s253_s20 = spop %252 }
  0xf9   :  { %s115_s21 = smul.f32 0.02173913, %s253_s20  ;;  %s255_s22 = spop %254 }
  0xfa   :  { %s135_s23 = smul.f32 0.027777778, %s255_s22  ;;  %s257_s24 = spop %256 }
  0xfb   :  { %s244_s25 = sadd.f32 -2.0794415, %s115_s21  ;;  %s155_s26 = smul.f32 0.05, %s257_s24 }
  0xfc   :  { %s245_s27 = sadd.f32 -2.0794415, %s135_s23  ;;  %s259_s28 = spop %258 }
  0xfd   :  { %s117_s29 = sadd.f32 %s244_s25, %s243_s19  ;;  %v119_v35 = vstv %s244_s25  ;;  %s175_s30 = smul.f32 0.125, %s259_s28 }
  0xfe   :  { %v120_v36 = vsel %vm118_vm6, %v119_v35, %v100_v34  ;;  %v139_v37 = vstv %s245_s27  ;;  %s246_s3 = sadd.f32 -2.0794415, %s155_s26  ;;  %s261_s4 = spop %260 }
  0xff   :  { %s137_s5 = sadd.f32 %s245_s27, %s117_s29  ;;  %v140_v38 = vsel %vm138_vm7, %v139_v37, %v120_v36  ;;  %s195_s6 = smul.f32 0.010416667, %s261_s4 }
 0x100   :  { %s247_s7 = sadd.f32 -2.0794415, %s175_s30  ;;  %s263_s8 = spop %262  ;;  %v159_v39 = vstv %s246_s3 }
 0x101   :  { %s157_s9 = sadd.f32 %s246_s3, %s137_s5  ;;  %s215_s10 = smul.f32 0.02631579, %s263_s8  ;;  %v160_v40 = vsel %vm158_vm8, %v159_v39, %v140_v38 }
 0x102   :  { %s248_s11 = sadd.f32 -2.0794415, %s195_s6  ;;  %v179_v41 = vstv %s247_s7 }
 0x103   :  { %s177_s12 = sadd.f32 %s247_s7, %s157_s9  ;;  %v180_v42 = vsel %vm178_vm9, %v179_v41, %v160_v40 }
 0x104   :  { %s249_s13 = sadd.f32 -2.0794415, %s215_s10  ;;  %v199_v44 = vstv %s248_s11 }
 0x105   :  { %s197_s14 = sadd.f32 %s248_s11, %s177_s12  ;;  %v200_v45 = vsel %vm198_vm10, %v199_v44, %v180_v42 }
 0x106   :  { %v219_v43 = vstv %s249_s13 }
 0x107   :  { %s217_s1 = sadd.f32 %s249_s13, %s197_s14  ;;  %v220_v46 = vsel %vm218_vm11, %v219_v43, %v200_v45 }
 0x109   :  { %v222_v47 = vstv %s217_s1 }
 0x10a   :  { %v223_v48 = vsel %vm221_vm12, %v222_v47, %v220_v46 }
 0x10b   :  { %224 = vst [vmem:[#allocation8] sm:$0xff] %v223_v48 }
 0x10c   :  { %235 = dma.vmem_to_hbm [thread:$0]  %s231_s16, 128, %s233_s0, [#allocation5]  }
 0x10d   :  { %348 = dma.done.wait [#allocation5], 128  }
 0x10e   :  { %349 = vsyncadd [#allocation5], 4294967168 }
 0x10f   :  { %240 = vsyncpa [#allocation4], 1 }
 0x110   :  { %241 = vsyncpa [#allocation7], 1 }
 0x111   :  { %242 = vsyncpa [#allocation5], 1 }

</bundles_post_ra>
